<compile_context>
chip_gen: v7x
topology: tpu7x:2x2x1
jax: 0.10.0
libtpu: 0.0.40
codegen_flags: <defaults>
</compile_context>

<pallas_src>
import jax
import jax.numpy as jnp
from jax.experimental import pallas as pl
from jax.experimental.pallas import tpu as pltpu


# ----------------------------------------------------------------------------
# Kernel
# ----------------------------------------------------------------------------
def _q_sample_kernel(a_ref, c_ref, x_ref, noise_ref, out_ref):
    # a_ref / c_ref: (TILE_ROWS, 1) f32 per-row scales (gathered by t in wrapper)
    # x_ref / noise_ref / out_ref: (TILE_ROWS, L) sublane+lane-dense tiles.
    a = a_ref[...]                                 # (TILE_ROWS, 1) f32
    c = c_ref[...]                                 # (TILE_ROWS, 1) f32
    x = x_ref[...].astype(jnp.float32)             # no-op cast when already f32
    n = noise_ref[...].astype(jnp.float32)
    out_ref[...] = (a * x + c * n).astype(out_ref.dtype)


# ----------------------------------------------------------------------------
# Tiling helpers (run at trace time; shapes are static)
# ----------------------------------------------------------------------------
def _pick_lanes(n, max_lanes=4096):
    """Largest multiple of 128 that divides n, capped at max_lanes (None if
    n is not divisible by 128)."""
    best = None
    lane = 128
    while lane <= min(n, max_lanes):
        if n % lane == 0:
            best = lane
        lane += 128
    return best


def _pick_tile_rows(total_rows, lanes, itemsize, per_array_budget=2 << 20):
    """Pick a row-tile size: whole thing if it fits the per-array budget,
    otherwise the largest multiple of 8 dividing total_rows under budget."""
    max_rows = max(1, per_array_budget // (lanes * itemsize))
    if total_rows <= max_rows:
        return total_rows
    best = None
    r = 8
    while r <= max_rows:
        if total_rows % r == 0:
            best = r
        r += 8
    if best is not None:
        return best
    # Fallback: no multiple-of-8 divisor under budget; take the full extent
    # (correct; block shape equal to the full dim satisfies the (8,128) rule).
    return total_rows


# ----------------------------------------------------------------------------
# Schedule precompute (plain JAX, matches GaussianDiffusion.__init__)
# ----------------------------------------------------------------------------
def make_diffusion_schedule(time_steps, beta_start, beta_end):
    betas = jnp.linspace(beta_start, beta_end, time_steps, dtype=jnp.float32)
    alphas_bar = jnp.cumprod(betas, axis=0)        # NOTE: faithful to reference
    sqrt_alphas_bar = jnp.sqrt(alphas_bar)
    sqrt_one_minus_alphas_bar = jnp.sqrt(1.0 - alphas_bar)
    return sqrt_alphas_bar, sqrt_one_minus_alphas_bar


# ----------------------------------------------------------------------------
# Wrapper
# ----------------------------------------------------------------------------
def diffusion_forward(x_0, t, noise, sqrt_alphas_bar, sqrt_one_minus_alphas_bar):
    """Pallas implementation of Diffusion.forward (== q_sample)."""
    B, C, H, W = x_0.shape
    N = C * H * W
    out_dtype = x_0.dtype
    itemsize = jnp.dtype(out_dtype).itemsize

    # Lane-dense view: (TOTAL_ROWS, lanes) with lanes a large multiple of 128.
    lanes = _pick_lanes(N)
    if lanes is None:                  # N not divisible by 128: fall back
        lanes = N
    rows_per_batch = N // lanes
    total_rows = B * rows_per_batch

    x_2d = x_0.reshape(total_rows, lanes)
    n_2d = noise.reshape(total_rows, lanes)

    # Tiny O(B) gather in the wrapper (not the pre-scale anti-pattern); clamp t
    # so an out-of-range timestep can never index out of bounds.
    num_steps = sqrt_alphas_bar.shape[0]
    t_idx = jnp.clip(t.astype(jnp.int32), 0, num_steps - 1)
    a_col = jnp.repeat(sqrt_alphas_bar[t_idx].astype(jnp.float32),
                       rows_per_batch).reshape(total_rows, 1)
    c_col = jnp.repeat(sqrt_one_minus_alphas_bar[t_idx].astype(jnp.float32),
                       rows_per_batch).reshape(total_rows, 1)

    tile_rows = _pick_tile_rows(total_rows, lanes, itemsize)
    grid = (total_rows // tile_rows,)

    # VMEM budget: 3 big arrays x 2 buffers x tile + 2 padded scale columns x 2.
    big_tile_bytes = tile_rows * lanes * itemsize
    col_tile_bytes = ((tile_rows + 7) // 8) * 8 * 128 * 4   # (8,128)-padded f32
    vmem_needed = 6 * big_tile_bytes + 4 * col_tile_bytes
    vmem_limit = min(60 << 20, max(32 << 20, int(vmem_needed * 1.25)))

    total_elems = total_rows * lanes
    cost = pl.CostEstimate(
        flops=3 * total_elems,                     # 2 mul + 1 add per element
        transcendentals=0,
        bytes_accessed=3 * total_elems * itemsize + 2 * total_rows * 4,
    )

    out_2d = pl.pallas_call(
        _q_sample_kernel,
        out_shape=jax.ShapeDtypeStruct((total_rows, lanes), out_dtype),
        grid=grid,
        in_specs=[
            pl.BlockSpec((tile_rows, 1), lambda i: (i, 0)),      # a
            pl.BlockSpec((tile_rows, 1), lambda i: (i, 0)),      # c
            pl.BlockSpec((tile_rows, lanes), lambda i: (i, 0)),  # x_0
            pl.BlockSpec((tile_rows, lanes), lambda i: (i, 0)),  # noise
        ],
        out_specs=pl.BlockSpec((tile_rows, lanes), lambda i: (i, 0)),
        compiler_params=pltpu.CompilerParams(
            dimension_semantics=("parallel",),
            vmem_limit_bytes=vmem_limit,
        ),
        cost_estimate=cost,
        # TODO(synk): if x_0 is dead after this call, add
        # input_output_aliases={2: 0} to reuse its HBM buffer for the output.
    )(a_col, c_col, x_2d, n_2d)

    return out_2d.reshape(B, C, H, W)


# ----------------------------------------------------------------------------
# Demo / correctness check
# ----------------------------------------------------------------------------
if __name__ == "__main__":
    B, C, H, W = 2, 4, 16, 16
    TIME_STEPS = 100
    BETA_START, BETA_END = 1e-4, 2e-2

    key = jax.random.PRNGKey(0)
    kx, kn, kt = jax.random.split(key, 3)
    x_0 = jax.random.normal(kx, (B, C, H, W), dtype=jnp.float32)
    noise = jax.random.normal(kn, (B, C, H, W), dtype=jnp.float32)
    t = jax.random.randint(kt, (B,), 0, TIME_STEPS, dtype=jnp.int32)

    sqrt_ab, sqrt_1mab = make_diffusion_schedule(TIME_STEPS, BETA_START, BETA_END)

    fwd = jax.jit(diffusion_forward)
    out = fwd(x_0, t, noise, sqrt_ab, sqrt_1mab)
    out = jax.block_until_ready(out)

    # Pure-JAX reference (same semantics as GaussianDiffusion.q_sample).
    ref = (sqrt_ab[t][:, None, None, None] * x_0
           + sqrt_1mab[t][:, None, None, None] * noise)
    assert out.shape == (B, C, H, W)
    assert jnp.allclose(out, ref, atol=1e-6, rtol=1e-6)

    print("KERNEL_OK")
</pallas_src>

<mosaic_0001>
module attributes {stable_mosaic.version = 11 : i64} {
  func.func @_q_sample_kernel(%arg0: i32, %arg1: memref<2x1xf32, #tpu.memory_space<vmem>>, %arg2: memref<2x1xf32, #tpu.memory_space<vmem>>, %arg3: memref<2x1024xf32, #tpu.memory_space<vmem>>, %arg4: memref<2x1024xf32, #tpu.memory_space<vmem>>, %arg5: memref<2x1024xf32, #tpu.memory_space<vmem>>) attributes {dimension_semantics = [#tpu.dimension_semantics<parallel>], iteration_bounds = array<i64: 1>, scalar_prefetch = 0 : i64, scratch_operands = 0 : i64, tpu.core_type = #tpu.core_type<tc>, window_params = [{transform_indices = @transform_0, window_bounds = array<i64: 2, 1>}, {transform_indices = @transform_1, window_bounds = array<i64: 2, 1>}, {transform_indices = @transform_2, window_bounds = array<i64: 2, 1024>}, {transform_indices = @transform_3, window_bounds = array<i64: 2, 1024>}, {transform_indices = @transform_4, window_bounds = array<i64: 2, 1024>}]} {
    %c0 = arith.constant 0 : index
    %c0_0 = arith.constant 0 : index
    %0 = vector.load %arg1[%c0, %c0_0] : memref<2x1xf32, #tpu.memory_space<vmem>>, vector<2x1xf32>
    %c0_1 = arith.constant 0 : index
    %c0_2 = arith.constant 0 : index
    %1 = vector.load %arg2[%c0_1, %c0_2] : memref<2x1xf32, #tpu.memory_space<vmem>>, vector<2x1xf32>
    %c0_3 = arith.constant 0 : index
    %c0_4 = arith.constant 0 : index
    %2 = vector.load %arg3[%c0_3, %c0_4] : memref<2x1024xf32, #tpu.memory_space<vmem>>, vector<2x1024xf32>
    %c0_5 = arith.constant 0 : index
    %c0_6 = arith.constant 0 : index
    %3 = vector.load %arg4[%c0_5, %c0_6] : memref<2x1024xf32, #tpu.memory_space<vmem>>, vector<2x1024xf32>
    %4 = vector.broadcast %0 : vector<2x1xf32> to vector<2x1024xf32>
    %5 = arith.mulf %4, %2 : vector<2x1024xf32>
    %6 = vector.broadcast %1 : vector<2x1xf32> to vector<2x1024xf32>
    %7 = arith.mulf %6, %3 : vector<2x1024xf32>
    %8 = arith.addf %5, %7 : vector<2x1024xf32>
    %c0_7 = arith.constant 0 : index
    %c0_8 = arith.constant 0 : index
    %9 = vector.load %arg5[%c0_7, %c0_8] : memref<2x1024xf32, #tpu.memory_space<vmem>>, vector<2x1024xf32>
    tpu.vector_store %arg5[%c0_7, %c0_8], %8 {strides = array<i32>} : memref<2x1024xf32, #tpu.memory_space<vmem>>, vector<2x1024xf32>,
    return
  }
  func.func @transform_0(%arg0: i32) -> (i32, i32) {
    %c0_i32 = arith.constant 0 : i32
    %c0_i32_0 = arith.constant 0 : i32
    return %arg0, %c0_i32 : i32, i32
  }
  func.func @transform_1(%arg0: i32) -> (i32, i32) {
    %c0_i32 = arith.constant 0 : i32
    %c0_i32_0 = arith.constant 0 : i32
    return %arg0, %c0_i32 : i32, i32
  }
  func.func @transform_2(%arg0: i32) -> (i32, i32) {
    %c0_i32 = arith.constant 0 : i32
    %c0_i32_0 = arith.constant 0 : i32
    return %arg0, %c0_i32 : i32, i32
  }
  func.func @transform_3(%arg0: i32) -> (i32, i32) {
    %c0_i32 = arith.constant 0 : i32
    %c0_i32_0 = arith.constant 0 : i32
    return %arg0, %c0_i32 : i32, i32
  }
  func.func @transform_4(%arg0: i32) -> (i32, i32) {
    %c0_i32 = arith.constant 0 : i32
    %c0_i32_0 = arith.constant 0 : i32
    return %arg0, %c0_i32 : i32, i32
  }
}

</mosaic_0001>

<bundles_post_ra>
// kernel: diffusion_forward.1
= control target key start
LH: loop header
LB: loop body
LE: loop exit
PB: predicated region body
PF: predicated region fallthrough
CT: control target
= control target key end

     0   :  { %v202_v0 = vmov 0   ;;  %v203_v3 = vmov 1983009808   ;;  %v34_v5 = vlaneseq  ;;  %s253_s0 = inlined_call_operand.vmem [shape: f32[2,1], index: 0, kind: input, shape index: {}]   ;;  %s254_s1 = inlined_call_operand.vmem [shape: f32[2,1], index: 1, kind: input, shape index: {}]   ;;  %s255_s2 = inlined_call_operand.vmem [shape: f32[2,1024], index: 2, kind: input, shape index: {}]   ;;  %s256_s3 = inlined_call_operand.vmem [shape: f32[2,1024], index: 3, kind: input, shape index: {}]   ;;  %s257_s4 = inlined_call_operand.vmem [shape: f32[2,1024], index: 4, kind: output, shape index: {}]  }
   0x1   :  { %197 = vset.pattern.permute.xlu0 %v202_v0  ;;  %v17_v1 = vld [vmem:[%s253_s0] sm:$0x3]  ;;  %v32_v4 = vunpack.c.l.s4 %v203_v3  ;;  %v20_v9 = vld [vmem:[%s255_s2 + $0x8] sm:$0xff] }
   0x2   :  { %25 = vperm.xlu0 %197, %v17_v1   ;;  %v18_v2 = vld [vmem:[%s254_s1] sm:$0x3]  ;;  %v35_v7 = vshrl.u32 %v34_v5, 7  ;;  %v22_v11 = vld [vmem:[%s256_s3 + $0x8] sm:$0xff]  ;;  %v47_v14 = vcombine.high %v20_v9, %v20_v9 }
   0x3   :  { %v33_v6 = vunpack.c.0.s8 %v32_v4  ;;  %v19_v8 = vld [vmem:[%s255_s2] sm:$0xff]  ;;  %v104_v16 = vcombine.high %v22_v11, %v22_v11 }
   0x4   :  { %v21_v10 = vld [vmem:[%s256_s3] sm:$0xff]  ;;  %v30_v12 = vcombine.high %v19_v8, %v19_v8 }
   0x5   :  { %v36_v13 = vsub.s32 %v33_v6, %v35_v7  ;;  %v87_v15 = vcombine.high %v21_v10, %v21_v10 }
   0x6   :  { %82 = vperm.xlu0 %197, %v18_v2  }
   0x7   :  { %v37_v17 = vrot.slane %v19_v8, %v36_v13  ;;  %v44_v18 = vrot.slane %v30_v12, %v36_v13  ;;  %v54_v19 = vrot.slane %v20_v9, %v36_v13  ;;  %v61_v20 = vrot.slane %v47_v14, %v36_v13 }
   0x8   :  { %v94_v21 = vrot.slane %v21_v10, %v36_v13  ;;  %v101_v22 = vrot.slane %v87_v15, %v36_v13  ;;  %v111_v23 = vrot.slane %v22_v11, %v36_v13  ;;  %v118_v24 = vrot.slane %v104_v16, %v36_v13 }
   0x9   :  { %v45_v25 = vcombine.high %v37_v17, %v37_v17  ;;  %v46_v26 = vcombine.high %v44_v18, %v44_v18  ;;  %v62_v28 = vcombine.high %v54_v19, %v54_v19  ;;  %v63_v29 = vcombine.high %v61_v20, %v61_v20 }
   0xa   :  { %v102_v30 = vcombine.high %v94_v21, %v94_v21  ;;  %v103_v31 = vcombine.high %v101_v22, %v101_v22  ;;  %v119_v32 = vcombine.high %v111_v23, %v111_v23  ;;  %v120_v33 = vcombine.high %v118_v24, %v118_v24 }
  0x81   :  { %v26_v27 = vpop.permute.xlu0 %25 }
  0x82   :  { %v72_v34 = vmul.f32 %v37_v17, %v26_v27  ;;  %v73_v35 = vmul.f32 %v45_v25, %v26_v27  ;;  %v74_v36 = vmul.f32 %v44_v18, %v26_v27  ;;  %v75_v37 = vmul.f32 %v46_v26, %v26_v27 }
  0x83   :  { %v76_v38 = vmul.f32 %v54_v19, %v26_v27  ;;  %v77_v39 = vmul.f32 %v62_v28, %v26_v27  ;;  %v78_v40 = vmul.f32 %v61_v20, %v26_v27  ;;  %v79_v41 = vmul.f32 %v63_v29, %v26_v27 }
  0x85   :  { %v83_v42 = vpop.permute.xlu0 %82 }
  0x86   :  { %v129_v43 = vmul.f32 %v94_v21, %v83_v42  ;;  %v130_v44 = vmul.f32 %v102_v30, %v83_v42  ;;  %v131_v45 = vmul.f32 %v101_v22, %v83_v42  ;;  %v132_v46 = vmul.f32 %v103_v31, %v83_v42 }
  0x87   :  { %v133_v47 = vmul.f32 %v111_v23, %v83_v42  ;;  %v134_v48 = vmul.f32 %v119_v32, %v83_v42  ;;  %v135_v49 = vmul.f32 %v118_v24, %v83_v42  ;;  %v136_v50 = vmul.f32 %v120_v33, %v83_v42 }
  0x88   :  { %v137_v51 = vadd.f32 %v129_v43, %v72_v34  ;;  %v138_v52 = vadd.f32 %v130_v44, %v73_v35  ;;  %v139_v53 = vadd.f32 %v131_v45, %v74_v36  ;;  %v140_v54 = vadd.f32 %v132_v46, %v75_v37 }
  0x89   :  { %v141_v55 = vadd.f32 %v133_v47, %v76_v38  ;;  %v142_v56 = vadd.f32 %v134_v48, %v77_v39  ;;  %v143_v57 = vadd.f32 %v135_v49, %v78_v40  ;;  %v144_v58 = vadd.f32 %v136_v50, %v79_v41 }
  0x8a   :  { %v153_v59 = vcombine.low %v137_v51, %v138_v52  ;;  %v154_v60 = vcombine.low %v139_v53, %v140_v54 }
  0x8b   :  { %v170_v61 = vcombine.low %v141_v55, %v142_v56  ;;  %v171_v62 = vcombine.low %v143_v57, %v144_v58 }
  0x8c   :  { %v161_v63 = vrot.slane %v153_v59, %v36_v13  ;;  %v168_v0 = vrot.slane %v154_v60, %v36_v13 }
  0x8d   :  { %v178_v1 = vrot.slane %v170_v61, %v36_v13  ;;  %v185_v2 = vrot.slane %v171_v62, %v36_v13 }
  0x8e   :  { %v169_v3 = vcombine.low %v161_v63, %v168_v0 }
  0x8f   :  { %v186_v4 = vcombine.low %v178_v1, %v185_v2 }
  0x90   :  { %189 = vst [vmem:[%s257_s4] sm:$0xff] %v169_v3 }
  0x91   :  { %190 = vst [vmem:[%s257_s4 + $0x8] sm:$0xff] %v186_v4 }

</bundles_post_ra>
